<compile_context>
chip_gen: v6e
topology: v6e:2x2x1
jax: 0.10.0
libtpu: 0.0.40
codegen_flags: <defaults>
</compile_context>

<pallas_src>
import math

import jax
import jax.numpy as jnp
from jax.experimental import pallas as pl
from jax.experimental.pallas import tpu as pltpu

_LANES = 128
_SUB = 8
_MAX_BLOCK_ROWS = 2048          # 2048 * 128 * 4B = 1 MiB per f32 input block


# ---------------------------------------------------------------------------
# Kernels
# ---------------------------------------------------------------------------
def _sq_diff_sum_kernel(a_ref, b_ref, o_ref, acc_ref):
    """Per-split partial of sum((a - b)^2) -> o_ref row (1, 128)."""
    step = pl.program_id(1)

    @pl.when(step == 0)
    def _():
        acc_ref[...] = jnp.zeros_like(acc_ref)

    a = a_ref[...].astype(jnp.float32)
    b = b_ref[...].astype(jnp.float32)
    d = a - b
    # Fold (block_rows, 128) -> (8, 128) with VPU adds (tile-preserving reshape).
    acc_ref[...] += jnp.sum((d * d).reshape(-1, _SUB, _LANES), axis=0)

    @pl.when(step == pl.num_programs(1) - 1)
    def _():
        # Single cross-sublane reduce at the very end; keep the output lane-dense.
        o_ref[...] = jnp.sum(acc_ref[...], axis=0, keepdims=True)


def _log_sum_kernel(x_ref, o_ref, acc_ref):
    """Per-split partial of sum(log(x)) -> o_ref row (1, 128)."""
    step = pl.program_id(1)

    @pl.when(step == 0)
    def _():
        acc_ref[...] = jnp.zeros_like(acc_ref)

    x = x_ref[...].astype(jnp.float32)
    acc_ref[...] += jnp.sum(jnp.log(x).reshape(-1, _SUB, _LANES), axis=0)

    @pl.when(step == pl.num_programs(1) - 1)
    def _():
        o_ref[...] = jnp.sum(acc_ref[...], axis=0, keepdims=True)


# ---------------------------------------------------------------------------
# Wrapper helpers
# ---------------------------------------------------------------------------
def _slab_params(n):
    """Pick (rows_padded, block_rows, num_blocks, num_splits) for n elements."""
    rows = -(-n // _LANES)                 # ceil(n / 128)
    rows = -(-rows // _SUB) * _SUB         # round up to a multiple of 8
    block_rows = min(_MAX_BLOCK_ROWS, rows)
    num_blocks = -(-rows // block_rows)
    num_splits = 2 if num_blocks >= 2 else 1     # 2-way split -> 2 TCs on v7x
    num_blocks = -(-num_blocks // num_splits) * num_splits
    rows_padded = num_blocks * block_rows
    return rows_padded, block_rows, num_blocks, num_splits


def _pad_reshape(flat, rows_padded, pad_value):
    """Pad (only if needed, with a neutral value) and view as (rows, 128)."""
    total = rows_padded * _LANES
    n = flat.shape[0]
    if n != total:
        flat = jnp.pad(flat, (0, total - n), constant_values=pad_value)
    return flat.reshape(rows_padded, _LANES)


def _reduce_call(kernel, slabs, block_rows, num_blocks, num_splits):
    blocks_per_split = num_blocks // num_splits
    in_spec = pl.BlockSpec(
        (block_rows, _LANES),
        lambda s, i, bps=blocks_per_split: (s * bps + i, 0))
    out = pl.pallas_call(
        kernel,
        out_shape=jax.ShapeDtypeStruct((num_splits, _LANES), jnp.float32),
        grid_spec=pltpu.PrefetchScalarGridSpec(
            num_scalar_prefetch=0,
            grid=(num_splits, blocks_per_split),
            in_specs=[in_spec] * len(slabs),
            out_specs=pl.BlockSpec((1, _LANES), lambda s, i: (s, 0)),
            scratch_shapes=[pltpu.VMEM((_SUB, _LANES), jnp.float32)],
        ),
        compiler_params=pltpu.CompilerParams(
            dimension_semantics=("parallel", "arbitrary")),
    )(*slabs)
    # Tiny final reduce of num_splits * 128 partials outside the kernel.
    return jnp.sum(out)


def sum_squared_diff(a, b):
    """sum((a - b)^2) over all elements, computed in a Pallas kernel."""
    a_flat = jnp.ravel(a)
    b_flat = jnp.ravel(b)
    rows, block_rows, num_blocks, num_splits = _slab_params(a_flat.shape[0])
    # Zero padding -> padded diff is 0, contributes nothing.
    a_slab = _pad_reshape(a_flat, rows, 0.0)
    b_slab = _pad_reshape(b_flat, rows, 0.0)
    return _reduce_call(_sq_diff_sum_kernel, (a_slab, b_slab),
                        block_rows, num_blocks, num_splits)


def sum_log(x_flat):
    """sum(log(x)) over a flat array, computed in a Pallas kernel."""
    rows, block_rows, num_blocks, num_splits = _slab_params(x_flat.shape[0])
    # Padding with 1 -> log(1) = 0, contributes nothing.
    x_slab = _pad_reshape(x_flat, rows, 1.0)
    return _reduce_call(_log_sum_kernel, (x_slab,),
                        block_rows, num_blocks, num_splits)


def rate_distortion_loss(output, target, lmbda=0.01):
    """JAX/Pallas equivalent of RateDistortionLoss.forward.

    output: dict with keys 'x_hat' (N,C,H,W) and 'likelihoods' (dict of arrays)
    target: (N,C,H,W)
    """
    N, _, H, W = target.shape
    num_pixels = N * H * W

    # Fuse all likelihood tensors into one sum-log launch.
    lik_flats = [jnp.ravel(lk) for lk in output['likelihoods'].values()]
    all_lik = lik_flats[0] if len(lik_flats) == 1 else jnp.concatenate(lik_flats)
    bpp_loss = sum_log(all_lik) / (-math.log(2) * num_pixels)

    # mse_loss = mean((x_hat - target)^2)  (nn.MSELoss default reduction='mean')
    x_hat = output['x_hat']
    n_elems = 1
    for d in target.shape:
        n_elems *= d
    mse_loss = sum_squared_diff(x_hat, target) / jnp.float32(n_elems)

    loss = lmbda * (255.0 ** 2) * mse_loss + bpp_loss
    return {'bpp_loss': bpp_loss, 'mse_loss': mse_loss, 'loss': loss}


# ---------------------------------------------------------------------------
# Main
# ---------------------------------------------------------------------------
if __name__ == "__main__":
    key = jax.random.PRNGKey(0)
    k1, k2, k3, k4 = jax.random.split(key, 4)

    N, C, H, W = 2, 4, 16, 16
    target = jax.random.normal(k1, (N, C, H, W), dtype=jnp.float32)
    x_hat = target + 0.05 * jax.random.normal(k2, (N, C, H, W), dtype=jnp.float32)

    # Synthetic likelihoods in (0, 1], typical of a compression entropy model.
    lik_y = jax.random.uniform(k3, (N, 8, 4, 4), dtype=jnp.float32,
                               minval=0.05, maxval=1.0)
    lik_z = jax.random.uniform(k4, (N, 8, 2, 2), dtype=jnp.float32,
                               minval=0.05, maxval=1.0)

    output = {'x_hat': x_hat, 'likelihoods': {'y': lik_y, 'z': lik_z}}

    out = rate_distortion_loss(output, target, lmbda=0.01)
    out = jax.tree_util.tree_map(jax.block_until_ready, out)

    # Pure-JAX reference check.
    num_pixels = N * H * W
    bpp_ref = (jnp.sum(jnp.log(lik_y)) + jnp.sum(jnp.log(lik_z))) / (
        -math.log(2) * num_pixels)
    mse_ref = jnp.mean((x_hat - target) ** 2)
    loss_ref = 0.01 * 255.0 ** 2 * mse_ref + bpp_ref

    assert jnp.allclose(out['bpp_loss'], bpp_ref, rtol=1e-5, atol=1e-5)
    assert jnp.allclose(out['mse_loss'], mse_ref, rtol=1e-5, atol=1e-6)
    assert jnp.allclose(out['loss'], loss_ref, rtol=1e-5, atol=1e-5)

    print("KERNEL_OK")
</pallas_src>

<mosaic_0001>
module attributes {stable_mosaic.version = 11 : i64} {
  func.func @_log_sum_kernel(%arg0: i32, %arg1: i32, %arg2: memref<8x128xf32, #tpu.memory_space<vmem>>, %arg3: memref<1x128xf32, #tpu.memory_space<vmem>>, %arg4: memref<8x128xf32, #tpu.memory_space<vmem>>) attributes {dimension_semantics = [#tpu.dimension_semantics<parallel>, #tpu.dimension_semantics<arbitrary>], iteration_bounds = array<i64: 1, 1>, scalar_prefetch = 0 : i64, scratch_operands = 1 : i64, tpu.core_type = #tpu.core_type<tc>, window_params = [{transform_indices = @transform_0, window_bounds = array<i64: 8, 128>}, {transform_indices = @transform_1, window_bounds = array<i64: 1, 128>}]} {
    %c0_i32 = arith.constant 0 : i32
    %0 = arith.cmpi eq, %arg1, %c0_i32 : i32
    %1 = arith.extui %0 : i1 to i32
    %c0_i32_0 = arith.constant 0 : i32
    %2 = arith.cmpi ne, %1, %c0_i32_0 : i32
    scf.if %2 {
      %cst_8 = arith.constant 0.000000e+00 : f32
      %13 = vector.broadcast %cst_8 : f32 to vector<8x128xf32>
      %c0_9 = arith.constant 0 : index
      %c0_10 = arith.constant 0 : index
      %14 = vector.load %arg4[%c0_9, %c0_10] : memref<8x128xf32, #tpu.memory_space<vmem>>, vector<8x128xf32>
      tpu.vector_store %arg4[%c0_9, %c0_10], %13 {strides = array<i32>} : memref<8x128xf32, #tpu.memory_space<vmem>>, vector<8x128xf32>,
    } else {
    }
    %c0 = arith.constant 0 : index
    %c0_1 = arith.constant 0 : index
    %3 = vector.load %arg2[%c0, %c0_1] : memref<8x128xf32, #tpu.memory_space<vmem>>, vector<8x128xf32>
    %c0_2 = arith.constant 0 : index
    %c0_3 = arith.constant 0 : index
    %4 = vector.load %arg4[%c0_2, %c0_3] : memref<8x128xf32, #tpu.memory_space<vmem>>, vector<8x128xf32>
    %5 = math.log %3 : vector<8x128xf32>
    %6 = vector.shape_cast %5 : vector<8x128xf32> to vector<1x8x128xf32>
    %cst = arith.constant dense<0.000000e+00> : vector<8x128xf32>
    %7 = vector.multi_reduction <add>, %6, %cst [0] : vector<1x8x128xf32> to vector<8x128xf32>
    %8 = arith.addf %4, %7 : vector<8x128xf32>
    %c0_4 = arith.constant 0 : index
    %c0_5 = arith.constant 0 : index
    %9 = vector.load %arg4[%c0_4, %c0_5] : memref<8x128xf32, #tpu.memory_space<vmem>>, vector<8x128xf32>
    tpu.vector_store %arg4[%c0_4, %c0_5], %8 {strides = array<i32>} : memref<8x128xf32, #tpu.memory_space<vmem>>, vector<8x128xf32>,
    %c0_i32_6 = arith.constant 0 : i32
    %10 = arith.cmpi eq, %arg1, %c0_i32_6 : i32
    %11 = arith.extui %10 : i1 to i32
    %c0_i32_7 = arith.constant 0 : i32
    %12 = arith.cmpi ne, %11, %c0_i32_7 : i32
    scf.if %12 {
      %c0_8 = arith.constant 0 : index
      %c0_9 = arith.constant 0 : index
      %13 = vector.load %arg4[%c0_8, %c0_9] : memref<8x128xf32, #tpu.memory_space<vmem>>, vector<8x128xf32>
      %cst_10 = arith.constant dense<0.000000e+00> : vector<128xf32>
      %14 = vector.multi_reduction <add>, %13, %cst_10 [0] : vector<8x128xf32> to vector<128xf32>
      %15 = vector.shape_cast %14 : vector<128xf32> to vector<1x128xf32>
      %c0_11 = arith.constant 0 : index
      %c0_12 = arith.constant 0 : index
      %16 = vector.load %arg3[%c0_11, %c0_12] : memref<1x128xf32, #tpu.memory_space<vmem>>, vector<1x128xf32>
      tpu.vector_store %arg3[%c0_11, %c0_12], %15 {strides = array<i32>} : memref<1x128xf32, #tpu.memory_space<vmem>>, vector<1x128xf32>,
    } else {
    }
    return
  }
  func.func @transform_0(%arg0: i32, %arg1: i32) -> (i32, i32) {
    %c1_i32 = arith.constant 1 : i32
    %0 = arith.muli %arg0, %c1_i32 : i32
    %1 = arith.addi %0, %arg1 : i32
    %c0_i32 = arith.constant 0 : i32
    %c0_i32_0 = arith.constant 0 : i32
    return %1, %c0_i32 : i32, i32
  }
  func.func @transform_1(%arg0: i32, %arg1: i32) -> (i32, i32) {
    %c0_i32 = arith.constant 0 : i32
    %c0_i32_0 = arith.constant 0 : i32
    return %arg0, %c0_i32 : i32, i32
  }
}

</mosaic_0001>

<bundles_post_ra>
// kernel: tpu_custom_call.1
= control target key start
LH: loop header
LB: loop body
LE: loop exit
PB: predicated region body
PF: predicated region fallthrough
CT: control target
= control target key end

     0   :  { %6 = vsyncpa [#allocation4], 0  ;;  %s129_s0 = inlined_call_operand.hbm [shape: f32[8,128], index: 0, kind: input, shape index: {}]   ;;  %s130_s1 = inlined_call_operand.hbm [shape: f32[1,128], index: 1, kind: output, shape index: {}]  }
   0x1   :  { %7 = vsyncpa [#allocation5], 0  ;;  %s111_s6 = smov [#allocation3]  }
   0x2   :  { %s17_s7 = sshll.u32 %s111_s6, 4  ;;  %s18_s7 = int_to_ptr.vmem [resolvable:$true] %s17_s7 }
   0x3   :  { %s75_s8 = scalar_lea.vmem %s18_s7, 128  ;;  %p80_p1 = scmp.lt.s32.totalorder %s18_s7, %s18_s7 }
   0x4   :  { %p76_p0 = scmp.ne.s32.totalorder %s18_s7, %s75_s8  ;;  %p81_p2 = scmp.lt.s32.totalorder %s75_s8, %s75_s8 }
   0x6   :  { %p82_p3 = por %p81_p2, %p80_p1 }
   0x8   :  { %p83_p4 = pnand %p82_p3, %p76_p0 }
   0xa   :  { %86 = shalt.err (!%p83_p4)
}
   0xb   :  { %20 = dma.hbm_to_vmem [thread:$0]  %s129_s0, 128, %s18_s7, [#allocation4]  }
   0xc   :  { %107 = dma.done.wait [#allocation4], 128  }
   0xd   :  { %108 = vsyncadd [#allocation4], 4294967168  ;;  %v30_v0 = vld [vmem:[#allocation3] sm:$0xff]  ;;  %s112_s11 = smov [#allocation6]  }
   0xe   :  { %65 = vlog2.f32 %v30_v0  ;;  %s54_s12 = sshll.u32 %s112_s11, 4  ;;  %s55_s12 = int_to_ptr.vmem [resolvable:$true] %s54_s12 }
   0xf   :  { %s87_s13 = scalar_lea.vmem %s55_s12, 16  ;;  %s91_s14 = scalar_lea.vmem %s55_s12, 32 }
  0x10   :  { %p88_p5 = scmp.ne.s32.totalorder %s55_s12, %s87_s13  ;;  %p92_p6 = scmp.lt.s32.totalorder %s55_s12, %s55_s12 }
  0x11   :  { %p93_p7 = scmp.lt.s32.totalorder %s91_s14, %s87_s13 }
  0x13   :  { %p94_p8 = por %p93_p7, %p92_p6 }
  0x15   :  { %p95_p9 = pnand %p94_p8, %p88_p5 }
  0x1b   :  { %v66_v1 = vpop.eup %65 }
  0x1c   :  { %v33_v2 = vmul.f32 0.6931472, %v66_v1 }
  0x1e   :  { %v41_v3 = vrot.slane %v33_v2, 4 }
  0x20   :  { %v42_v4 = vadd.f32 %v41_v3, %v33_v2 }
  0x22   :  { %v43_v5 = vrot.slane %v42_v4, 2 }
  0x24   :  { %v44_v6 = vadd.f32 %v43_v5, %v42_v4 }
  0x26   :  { %v45_v7 = vrot.slane %v44_v6, 1 }
  0x28   :  { %v46_v8 = vadd.f32 %v45_v7, %v44_v6 }
  0x2a   :  { %47 = vst [vmem:[#allocation6] sm:$0x1] %v46_v8 }
  0x2b   :  { %98 = shalt.err (!%p95_p9)
}
  0x2c   :  { %57 = dma.vmem_to_hbm [thread:$0]  %s55_s12, 16, %s130_s1, [#allocation5]  }
  0x2d   :  { %109 = dma.done.wait [#allocation5], 16  }
  0x2e   :  { %110 = vsyncadd [#allocation5], 4294967280 }
  0x2f   :  { %61 = vsyncpa [#allocation4], 1 }
  0x30   :  { %62 = vsyncpa [#allocation5], 1 }

</bundles_post_ra>
